<compile_context>
chip_gen: v6e
topology: v6e:2x2x1
jax: 0.10.0
libtpu: 0.0.40
codegen_flags: <defaults>
</compile_context>

<pallas_src>
import functools

import jax
import jax.numpy as jnp
from jax import lax
from jax.experimental import pallas as pl
from jax.experimental.pallas import tpu as pltpu


def _round_up(x, m):
    return ((x + m - 1) // m) * m


def _pick_tile_t(T, target):
    """Largest multiple-of-8 tile <= target that divides T (falls back to T)."""
    if T % 8 == 0:
        cand = min(target, T)
        cand -= cand % 8
        while cand >= 8:
            if T % cand == 0:
                return cand
            cand -= 8
    return T


# ---------------------------------------------------------------------------
# Fused kernel: all conv layers + ReLU + optional channel max-pool
# ---------------------------------------------------------------------------
def _fused_tcn_kernel(x_ref, *rest, layer_cfg, halo, tile_t, n_t, pooling):
    """One (batch row, time tile) step of the fused temporal conv net.

    x_ref  : (TILE_T, C_in)            current time-tile (batch dim squeezed)
    rest   : w_0, b_0, ..., w_{L-1}, b_{L-1}, o_ref, carry_ref, win_ref
      w_l  : (K_l, C_in_l, C_out_l)    tap-major conv weights
      b_l  : (1, C_out_l)              bias
      o_ref: (TILE_T, 1) if pooling else (TILE_T, C_last)
      carry_ref : (HALO, C_in) VMEM    causal history carried across T-tiles
      win_ref   : (HALO + TILE_T, C_in) VMEM  assembled input window
    """
    n_layers = len(layer_cfg)
    w_refs = rest[0:2 * n_layers:2]
    b_refs = rest[1:2 * n_layers:2]
    o_ref = rest[2 * n_layers]
    carry_ref = rest[2 * n_layers + 1]
    win_ref = rest[2 * n_layers + 2]

    t = pl.program_id(1)

    # Start of every batch row: the causal history is the conv's zero padding.
    @pl.when(t == 0)
    def _():
        carry_ref[...] = jnp.zeros(carry_ref.shape, carry_ref.dtype)

    # Assemble [history | current tile] contiguously in VMEM (no HBM pad copy).
    win_ref[0:halo, :] = carry_ref[...]
    win_ref[halo:, :] = x_ref[...].astype(jnp.float32)

    # Save the last HALO raw-input rows as history for the next T-tile.
    if n_t > 1:
        if halo <= tile_t:
            # History comes entirely from the current input tile.
            carry_ref[...] = x_ref[tile_t - halo:, :].astype(jnp.float32)
        else:
            carry_ref[...] = win_ref[tile_t:, :]

    # Row-index iota hoisted out of the layer loop (JAX does not CSE broadcasts).
    row_idx_full = lax.broadcasted_iota(jnp.int32, (halo + tile_t, 1), 0)

    y = win_ref[...]                       # (HALO + TILE_T, C_in), f32
    cum_pad = 0
    for li, ((ksize, dil, _c_in, c_out), w_ref, b_ref) in enumerate(
            zip(layer_cfg, w_refs, b_refs)):
        pad = (ksize - 1) * dil
        cum_pad += pad
        rows_out = y.shape[0] - pad        # static
        acc = jnp.zeros((rows_out, c_out), jnp.float32)
        # K is tiny & static -> unrolled per-tap 2-D matmuls on the MXU.
        for k in range(ksize):
            xs = y[k * dil: k * dil + rows_out, :]          # (rows_out, C_in_l)
            acc = acc + jnp.dot(xs, w_ref[k],
                                preferred_element_type=jnp.float32)
        y = jnp.maximum(acc + b_ref[...], 0.0)              # bias + ReLU
        # TODO(synk): nn.Dropout has no inference-time effect; treated as identity.

        # Rows of this layer's output that lie before the sequence start must be
        # zero (exactly what the next Conv1d's zero padding + Chomp1d provide in
        # PyTorch).  Row r of this layer maps to global time
        # t*TILE_T - HALO + cum_pad + r, so zero rows r < HALO - cum_pad - t*TILE_T.
        if li < n_layers - 1:
            thresh = (halo - cum_pad) - t * tile_t
            y = jnp.where(row_idx_full[:rows_out] >= thresh, y, 0.0)

    # y has tile_t + (halo - total_pad) exact rows; the tile output is the last
    # tile_t rows (these always correspond to global times >= 0).
    out_rows = y[y.shape[0] - tile_t:, :]
    if pooling:
        # nn.MaxPool1d(C_last) over channels -> one value per time step.
        o_ref[...] = jnp.max(out_rows, axis=-1, keepdims=True).astype(o_ref.dtype)
    else:
        o_ref[...] = out_rows.astype(o_ref.dtype)


# ---------------------------------------------------------------------------
# Wrapper around pallas_call
# ---------------------------------------------------------------------------
def fused_temporal_conv(x, weights, biases, layer_cfg, *, pooling,
                        tile_t_target=1024):
    """x: (B, T, C_in) f32 -> (B, T, 1) if pooling else (B, T, C_last)."""
    B, T, C_in = x.shape
    c_last = layer_cfg[-1][3]
    out_ch = 1 if pooling else c_last

    total_pad = sum((k - 1) * d for (k, d, _, _) in layer_cfg)
    halo = max(8, _round_up(total_pad, 8))     # sublane-aligned causal history
    tile_t = _pick_tile_t(T, tile_t_target)
    assert T % tile_t == 0
    n_t = T // tile_t

    x = x.astype(jnp.float32)

    in_specs = [pl.BlockSpec((None, tile_t, C_in), lambda b, t: (b, t, 0))]
    operands = [x]
    for w, bvec, (k, d, ci, co) in zip(weights, biases, layer_cfg):
        # Constant index_map -> weights/bias are fetched into VMEM only once.
        in_specs.append(pl.BlockSpec(w.shape, lambda b, t: (0, 0, 0)))
        in_specs.append(pl.BlockSpec((1, co), lambda b, t: (0, 0)))
        operands.append(w.astype(jnp.float32))
        operands.append(bvec.reshape(1, co).astype(jnp.float32))

    out_shape = jax.ShapeDtypeStruct((B, T, out_ch), jnp.float32)
    out_specs = pl.BlockSpec((None, tile_t, out_ch), lambda b, t: (b, t, 0))

    flops = 2 * B * T * sum(k * ci * co for (k, d, ci, co) in layer_cfg)
    bytes_accessed = 4 * (B * T * C_in + B * T * out_ch +
                          sum(int(w.size) + int(bv.size)
                              for w, bv in zip(weights, biases)))

    kernel = functools.partial(
        _fused_tcn_kernel,
        layer_cfg=tuple(tuple(c) for c in layer_cfg),
        halo=halo, tile_t=tile_t, n_t=n_t, pooling=pooling)

    return pl.pallas_call(
        kernel,
        out_shape=out_shape,
        grid=(B, n_t),
        in_specs=in_specs,
        out_specs=out_specs,
        scratch_shapes=[
            pltpu.VMEM((halo, C_in), jnp.float32),            # causal history
            pltpu.VMEM((halo + tile_t, C_in), jnp.float32),   # assembled window
        ],
        compiler_params=pltpu.CompilerParams(
            # Batch rows are independent -> shard across TensorCores (v7x: 2 TCs).
            # The time axis carries the causal history in scratch -> sequential.
            dimension_semantics=("parallel", "arbitrary"),
        ),
        cost_estimate=pl.CostEstimate(
            flops=flops, transcendentals=0, bytes_accessed=bytes_accessed),
    )(*operands)


# ---------------------------------------------------------------------------
# TemporalEncoder (forward pass only; Dropout is identity at inference)
# ---------------------------------------------------------------------------
class TemporalEncoderPallas:
    def __init__(self, input_size, *, temporal_hidden_sizes, temporal_kernel_sizes,
                 temporal_dropout=0.0, pooling=True, dilation=2, seed=0):
        assert len(temporal_hidden_sizes) == len(temporal_kernel_sizes)
        self.pooling = pooling
        self.temporal_dim = 1 if pooling else temporal_hidden_sizes[-1]
        self.layer_cfg = []   # (kernel_size, dilation, C_in, C_out) per layer
        self.weights = []     # tap-major (K, C_in, C_out)
        self.biases = []      # (C_out,)
        key = jax.random.PRNGKey(seed)
        in_ch = input_size
        for i, (out_ch, ks) in enumerate(zip(temporal_hidden_sizes,
                                             temporal_kernel_sizes)):
            d = dilation ** i
            key, kw, kb = jax.random.split(key, 3)
            # PyTorch Conv1d weight is (C_out, C_in, K); store tap-major.
            w_pt = 0.1 * jax.random.normal(kw, (out_ch, in_ch, ks), jnp.float32)
            b = 0.1 * jax.random.normal(kb, (out_ch,), jnp.float32)
            self.weights.append(jnp.transpose(w_pt, (2, 1, 0)))
            self.biases.append(b)
            self.layer_cfg.append((ks, d, in_ch, out_ch))
            in_ch = out_ch

    def __call__(self, x, *, tile_t_target=1024):
        # x: (B, T, input_size); mirrors `.type('torch.FloatTensor')`.
        return fused_temporal_conv(
            x.astype(jnp.float32), self.weights, self.biases, self.layer_cfg,
            pooling=self.pooling, tile_t_target=tile_t_target)


# ---------------------------------------------------------------------------
# Pure-JAX reference (mirrors the PyTorch per-layer pad/conv/relu/chomp + pool)
# ---------------------------------------------------------------------------
def _reference(x, weights, biases, layer_cfg, pooling):
    out = x.astype(jnp.float32)
    for w, b, (ks, d, ci, co) in zip(weights, biases, layer_cfg):
        T = out.shape[1]
        pad = (ks - 1) * d
        xp = jnp.pad(out, ((0, 0), (pad, 0), (0, 0)))
        acc = jnp.zeros((out.shape[0], T, co), jnp.float32)
        for k in range(ks):
            acc = acc + jnp.einsum("btc,cd->btd", xp[:, k * d: k * d + T, :], w[k])
        out = jnp.maximum(acc + b[None, None, :], 0.0)
    if pooling:
        out = jnp.max(out, axis=-1, keepdims=True)
    return out


if __name__ == "__main__":
    B, T, C_in = 2, 64, 8
    hidden_sizes = [16, 16]
    kernel_sizes = [3, 3]

    key = jax.random.PRNGKey(0)
    x = jax.random.normal(key, (B, T, C_in), jnp.float32)

    # pooling=True, small tile target so the multi-tile halo-carry path is
    # exercised (T=64 -> 4 time tiles of 16 rows; production default is 1024).
    enc = TemporalEncoderPallas(
        C_in,
        temporal_hidden_sizes=hidden_sizes,
        temporal_kernel_sizes=kernel_sizes,
        temporal_dropout=0.0,
        pooling=True,
        seed=0,
    )
    out = jax.block_until_ready(enc(x, tile_t_target=16))
    assert out.shape == (B, T, 1), out.shape
    ref = _reference(x, enc.weights, enc.biases, enc.layer_cfg, enc.pooling)
    if not jnp.allclose(out, ref, atol=1e-4, rtol=1e-4):
        raise AssertionError("Pallas output (pooling=True) does not match reference")

    # pooling=False, default tile target (single time tile) for the other path.
    enc2 = TemporalEncoderPallas(
        C_in,
        temporal_hidden_sizes=hidden_sizes,
        temporal_kernel_sizes=kernel_sizes,
        temporal_dropout=0.0,
        pooling=False,
        seed=1,
    )
    out2 = jax.block_until_ready(enc2(x))
    assert out2.shape == (B, T, hidden_sizes[-1]), out2.shape
    ref2 = _reference(x, enc2.weights, enc2.biases, enc2.layer_cfg, enc2.pooling)
    if not jnp.allclose(out2, ref2, atol=1e-4, rtol=1e-4):
        raise AssertionError("Pallas output (pooling=False) does not match reference")

    print("KERNEL_OK")
</pallas_src>

<mosaic_0001>
module attributes {stable_mosaic.version = 11 : i64} {
  func.func @_fused_tcn_kernel(%arg0: i32, %arg1: i32, %arg2: memref<1x16x8xf32, #tpu.memory_space<vmem>>, %arg3: memref<3x8x16xf32, #tpu.memory_space<vmem>>, %arg4: memref<1x16xf32, #tpu.memory_space<vmem>>, %arg5: memref<3x16x16xf32, #tpu.memory_space<vmem>>, %arg6: memref<1x16xf32, #tpu.memory_space<vmem>>, %arg7: memref<1x16x1xf32, #tpu.memory_space<vmem>>, %arg8: memref<8x8xf32, #tpu.memory_space<vmem>>, %arg9: memref<24x8xf32, #tpu.memory_space<vmem>>) attributes {dimension_semantics = [#tpu.dimension_semantics<parallel>, #tpu.dimension_semantics<arbitrary>], iteration_bounds = array<i64: 2, 4>, scalar_prefetch = 0 : i64, scratch_operands = 2 : i64, tpu.core_type = #tpu.core_type<tc>, window_params = [{transform_indices = @transform_0, window_bounds = array<i64: 1, 16, 8>}, {pipeline_mode = #tpu.pipeline_mode<synchronous>, transform_indices = @transform_1, window_bounds = array<i64: 3, 8, 16>}, {pipeline_mode = #tpu.pipeline_mode<synchronous>, transform_indices = @transform_2, window_bounds = array<i64: 1, 16>}, {pipeline_mode = #tpu.pipeline_mode<synchronous>, transform_indices = @transform_3, window_bounds = array<i64: 3, 16, 16>}, {pipeline_mode = #tpu.pipeline_mode<synchronous>, transform_indices = @transform_4, window_bounds = array<i64: 1, 16>}, {transform_indices = @transform_5, window_bounds = array<i64: 1, 16, 1>}]} {
    %c0_i32 = arith.constant 0 : i32
    %0 = arith.cmpi eq, %arg1, %c0_i32 : i32
    %1 = arith.extui %0 : i1 to i32
    %c0_i32_0 = arith.constant 0 : i32
    %2 = arith.cmpi ne, %1, %c0_i32_0 : i32
    scf.if %2 {
      %cst_49 = arith.constant 0.000000e+00 : f32
      %70 = vector.broadcast %cst_49 : f32 to vector<8x8xf32>
      %c0_50 = arith.constant 0 : index
      %c0_51 = arith.constant 0 : index
      %71 = vector.load %arg8[%c0_50, %c0_51] : memref<8x8xf32, #tpu.memory_space<vmem>>, vector<8x8xf32>
      tpu.vector_store %arg8[%c0_50, %c0_51], %70 {strides = array<i32>} : memref<8x8xf32, #tpu.memory_space<vmem>>, vector<8x8xf32>,
    } else {
    }
    %c0 = arith.constant 0 : index
    %c0_1 = arith.constant 0 : index
    %3 = vector.load %arg8[%c0, %c0_1] : memref<8x8xf32, #tpu.memory_space<vmem>>, vector<8x8xf32>
    %c0_2 = arith.constant 0 : index
    %c0_3 = arith.constant 0 : index
    %4 = vector.load %arg9[%c0_2, %c0_3] : memref<24x8xf32, #tpu.memory_space<vmem>>, vector<8x8xf32>
    tpu.vector_store %arg9[%c0_2, %c0_3], %3 {strides = array<i32>} : memref<24x8xf32, #tpu.memory_space<vmem>>, vector<8x8xf32>,
    %c0_4 = arith.constant 0 : index
    %c0_5 = arith.constant 0 : index
    %c0_6 = arith.constant 0 : index
    %5 = vector.load %arg2[%c0_4, %c0_5, %c0_6] : memref<1x16x8xf32, #tpu.memory_space<vmem>>, vector<1x16x8xf32>
    %6 = vector.shape_cast %5 : vector<1x16x8xf32> to vector<16x8xf32>
    %c8 = arith.constant 8 : index
    %c0_7 = arith.constant 0 : index
    %7 = vector.load %arg9[%c8, %c0_7] : memref<24x8xf32, #tpu.memory_space<vmem>>, vector<16x8xf32>
    tpu.vector_store %arg9[%c8, %c0_7], %6 {strides = array<i32>} : memref<24x8xf32, #tpu.memory_space<vmem>>, vector<16x8xf32>,
    %c0_8 = arith.constant 0 : index
    %c8_9 = arith.constant 8 : index
    %c0_10 = arith.constant 0 : index
    %8 = vector.load %arg2[%c0_8, %c8_9, %c0_10] : memref<1x16x8xf32, #tpu.memory_space<vmem>>, vector<1x8x8xf32>
    %9 = vector.shape_cast %8 : vector<1x8x8xf32> to vector<8x8xf32>
    %c0_11 = arith.constant 0 : index
    %c0_12 = arith.constant 0 : index
    %10 = vector.load %arg8[%c0_11, %c0_12] : memref<8x8xf32, #tpu.memory_space<vmem>>, vector<8x8xf32>
    tpu.vector_store %arg8[%c0_11, %c0_12], %9 {strides = array<i32>} : memref<8x8xf32, #tpu.memory_space<vmem>>, vector<8x8xf32>,
    %11 = tpu.iota {dimensions = array<i32: 0>} : vector<24x1xi32>
    %c0_13 = arith.constant 0 : index
    %c0_14 = arith.constant 0 : index
    %12 = vector.load %arg9[%c0_13, %c0_14] : memref<24x8xf32, #tpu.memory_space<vmem>>, vector<24x8xf32>
    %cst = arith.constant 0.000000e+00 : f32
    %13 = vector.broadcast %cst : f32 to vector<22x16xf32>
    %14 = vector.extract_strided_slice %12 {offsets = [0, 0], sizes = [22, 8], strides = [1, 1]} : vector<24x8xf32> to vector<22x8xf32>
    %c0_15 = arith.constant 0 : index
    %c0_16 = arith.constant 0 : index
    %c0_17 = arith.constant 0 : index
    %15 = vector.load %arg3[%c0_15, %c0_16, %c0_17] : memref<3x8x16xf32, #tpu.memory_space<vmem>>, vector<1x8x16xf32>
    %16 = vector.shape_cast %15 : vector<1x8x16xf32> to vector<8x16xf32>
    %cst_18 = arith.constant dense<0.000000e+00> : vector<22x16xf32>
    %17 = tpu.matmul %14, %16, %cst_18 {dimension_numbers = #tpu.dot_dimension_numbers<[1], [0], [0], [1], [0, 0, 1, 1], [], []>} : vector<22x8xf32>, vector<8x16xf32>, vector<22x16xf32> -> vector<22x16xf32>
    %18 = arith.addf %13, %17 : vector<22x16xf32>
    %19 = vector.extract_strided_slice %12 {offsets = [1, 0], sizes = [22, 8], strides = [1, 1]} : vector<24x8xf32> to vector<22x8xf32>
    %c1 = arith.constant 1 : index
    %c0_19 = arith.constant 0 : index
    %c0_20 = arith.constant 0 : index
    %20 = vector.load %arg3[%c1, %c0_19, %c0_20] : memref<3x8x16xf32, #tpu.memory_space<vmem>>, vector<1x8x16xf32>
    %21 = vector.shape_cast %20 : vector<1x8x16xf32> to vector<8x16xf32>
    %cst_21 = arith.constant dense<0.000000e+00> : vector<22x16xf32>
    %22 = tpu.matmul %19, %21, %cst_21 {dimension_numbers = #tpu.dot_dimension_numbers<[1], [0], [0], [1], [0, 0, 1, 1], [], []>} : vector<22x8xf32>, vector<8x16xf32>, vector<22x16xf32> -> vector<22x16xf32>
    %23 = arith.addf %18, %22 : vector<22x16xf32>
    %24 = vector.extract_strided_slice %12 {offsets = [2, 0], sizes = [22, 8], strides = [1, 1]} : vector<24x8xf32> to vector<22x8xf32>
    %c2 = arith.constant 2 : index
    %c0_22 = arith.constant 0 : index
    %c0_23 = arith.constant 0 : index
    %25 = vector.load %arg3[%c2, %c0_22, %c0_23] : memref<3x8x16xf32, #tpu.memory_space<vmem>>, vector<1x8x16xf32>
    %26 = vector.shape_cast %25 : vector<1x8x16xf32> to vector<8x16xf32>
    %cst_24 = arith.constant dense<0.000000e+00> : vector<22x16xf32>
    %27 = tpu.matmul %24, %26, %cst_24 {dimension_numbers = #tpu.dot_dimension_numbers<[1], [0], [0], [1], [0, 0, 1, 1], [], []>} : vector<22x8xf32>, vector<8x16xf32>, vector<22x16xf32> -> vector<22x16xf32>
    %28 = arith.addf %23, %27 : vector<22x16xf32>
    %c0_25 = arith.constant 0 : index
    %c0_26 = arith.constant 0 : index
    %29 = vector.load %arg4[%c0_25, %c0_26] : memref<1x16xf32, #tpu.memory_space<vmem>>, vector<1x16xf32>
    %30 = vector.broadcast %29 : vector<1x16xf32> to vector<22x16xf32>
    %31 = arith.addf %28, %30 : vector<22x16xf32>
    %cst_27 = arith.constant 0.000000e+00 : f32
    %32 = vector.broadcast %cst_27 : f32 to vector<22x16xf32>
    %33 = arith.maximumf %31, %32 : vector<22x16xf32>
    %c16_i32 = arith.constant 16 : i32
    %34 = arith.muli %arg1, %c16_i32 : i32
    %c6_i32 = arith.constant 6 : i32
    %35 = arith.subi %c6_i32, %34 : i32
    %36 = vector.extract_strided_slice %11 {offsets = [0, 0], sizes = [22, 1], strides = [1, 1]} : vector<24x1xi32> to vector<22x1xi32>
    %37 = vector.broadcast %35 : i32 to vector<22x1xi32>
    %38 = arith.cmpi sge, %36, %37 : vector<22x1xi32>
    %cst_28 = arith.constant 0.000000e+00 : f32
    %39 = vector.shape_cast %38 : vector<22x1xi1> to vector<22x1xi1>
    %40 = vector.broadcast %39 : vector<22x1xi1> to vector<22x16xi1>
    %41 = vector.broadcast %cst_28 : f32 to vector<22x16xf32>
    %42 = arith.select %40, %33, %41 : vector<22x16xi1>, vector<22x16xf32>
    %cst_29 = arith.constant 0.000000e+00 : f32
    %43 = vector.broadcast %cst_29 : f32 to vector<18x16xf32>
    %44 = vector.extract_strided_slice %42 {offsets = [0, 0], sizes = [18, 16], strides = [1, 1]} : vector<22x16xf32> to vector<18x16xf32>
    %c0_30 = arith.constant 0 : index
    %c0_31 = arith.constant 0 : index
    %c0_32 = arith.constant 0 : index
    %45 = vector.load %arg5[%c0_30, %c0_31, %c0_32] : memref<3x16x16xf32, #tpu.memory_space<vmem>>, vector<1x16x16xf32>
    %46 = vector.shape_cast %45 : vector<1x16x16xf32> to vector<16x16xf32>
    %cst_33 = arith.constant dense<0.000000e+00> : vector<18x16xf32>
    %47 = tpu.matmul %44, %46, %cst_33 {dimension_numbers = #tpu.dot_dimension_numbers<[1], [0], [0], [1], [0, 0, 1, 1], [], []>} : vector<18x16xf32>, vector<16x16xf32>, vector<18x16xf32> -> vector<18x16xf32>
    %48 = arith.addf %43, %47 : vector<18x16xf32>
    %49 = vector.extract_strided_slice %42 {offsets = [2, 0], sizes = [18, 16], strides = [1, 1]} : vector<22x16xf32> to vector<18x16xf32>
    %c1_34 = arith.constant 1 : index
    %c0_35 = arith.constant 0 : index
    %c0_36 = arith.constant 0 : index
    %50 = vector.load %arg5[%c1_34, %c0_35, %c0_36] : memref<3x16x16xf32, #tpu.memory_space<vmem>>, vector<1x16x16xf32>
    %51 = vector.shape_cast %50 : vector<1x16x16xf32> to vector<16x16xf32>
    %cst_37 = arith.constant dense<0.000000e+00> : vector<18x16xf32>
    %52 = tpu.matmul %49, %51, %cst_37 {dimension_numbers = #tpu.dot_dimension_numbers<[1], [0], [0], [1], [0, 0, 1, 1], [], []>} : vector<18x16xf32>, vector<16x16xf32>, vector<18x16xf32> -> vector<18x16xf32>
    %53 = arith.addf %48, %52 : vector<18x16xf32>
    %54 = vector.extract_strided_slice %42 {offsets = [4, 0], sizes = [18, 16], strides = [1, 1]} : vector<22x16xf32> to vector<18x16xf32>
    %c2_38 = arith.constant 2 : index
    %c0_39 = arith.constant 0 : index
    %c0_40 = arith.constant 0 : index
    %55 = vector.load %arg5[%c2_38, %c0_39, %c0_40] : memref<3x16x16xf32, #tpu.memory_space<vmem>>, vector<1x16x16xf32>
    %56 = vector.shape_cast %55 : vector<1x16x16xf32> to vector<16x16xf32>
    %cst_41 = arith.constant dense<0.000000e+00> : vector<18x16xf32>
    %57 = tpu.matmul %54, %56, %cst_41 {dimension_numbers = #tpu.dot_dimension_numbers<[1], [0], [0], [1], [0, 0, 1, 1], [], []>} : vector<18x16xf32>, vector<16x16xf32>, vector<18x16xf32> -> vector<18x16xf32>
    %58 = arith.addf %53, %57 : vector<18x16xf32>
    %c0_42 = arith.constant 0 : index
    %c0_43 = arith.constant 0 : index
    %59 = vector.load %arg6[%c0_42, %c0_43] : memref<1x16xf32, #tpu.memory_space<vmem>>, vector<1x16xf32>
    %60 = vector.broadcast %59 : vector<1x16xf32> to vector<18x16xf32>
    %61 = arith.addf %58, %60 : vector<18x16xf32>
    %cst_44 = arith.constant 0.000000e+00 : f32
    %62 = vector.broadcast %cst_44 : f32 to vector<18x16xf32>
    %63 = arith.maximumf %61, %62 : vector<18x16xf32>
    %64 = vector.extract_strided_slice %63 {offsets = [2, 0], sizes = [16, 16], strides = [1, 1]} : vector<18x16xf32> to vector<16x16xf32>
    %cst_45 = arith.constant dense<0xFF800000> : vector<16xf32>
    %65 = vector.multi_reduction <maximumf>, %64, %cst_45 [1] : vector<16x16xf32> to vector<16xf32>
    %66 = vector.shape_cast %65 : vector<16xf32> to vector<16x1xf32>
    %c0_46 = arith.constant 0 : index
    %c0_47 = arith.constant 0 : index
    %c0_48 = arith.constant 0 : index
    %67 = vector.load %arg7[%c0_46, %c0_47, %c0_48] : memref<1x16x1xf32, #tpu.memory_space<vmem>>, vector<1x16x1xf32>
    %68 = vector.shape_cast %67 : vector<1x16x1xf32> to vector<16x1xf32>
    %69 = vector.shape_cast %66 : vector<16x1xf32> to vector<1x16x1xf32>
    tpu.vector_store %arg7[%c0_46, %c0_47, %c0_48], %69 {strides = array<i32>} : memref<1x16x1xf32, #tpu.memory_space<vmem>>, vector<1x16x1xf32>,
    return
  }
  func.func @transform_0(%arg0: i32, %arg1: i32) -> (i32, i32, i32) {
    %c0_i32 = arith.constant 0 : i32
    %c0_i32_0 = arith.constant 0 : i32
    return %arg0, %arg1, %c0_i32 : i32, i32, i32
  }
  func.func @transform_1(%arg0: i32, %arg1: i32) -> (i32, i32, i32) {
    %c0_i32 = arith.constant 0 : i32
    %c0_i32_0 = arith.constant 0 : i32
    %c0_i32_1 = arith.constant 0 : i32
    %c0_i32_2 = arith.constant 0 : i32
    return %c0_i32, %c0_i32_0, %c0_i32_1 : i32, i32, i32
  }
  func.func @transform_2(%arg0: i32, %arg1: i32) -> (i32, i32) {
    %c0_i32 = arith.constant 0 : i32
    %c0_i32_0 = arith.constant 0 : i32
    %c0_i32_1 = arith.constant 0 : i32
    return %c0_i32, %c0_i32_0 : i32, i32
  }
  func.func @transform_3(%arg0: i32, %arg1: i32) -> (i32, i32, i32) {
    %c0_i32 = arith.constant 0 : i32
    %c0_i32_0 = arith.constant 0 : i32
    %c0_i32_1 = arith.constant 0 : i32
    %c0_i32_2 = arith.constant 0 : i32
    return %c0_i32, %c0_i32_0, %c0_i32_1 : i32, i32, i32
  }
  func.func @transform_4(%arg0: i32, %arg1: i32) -> (i32, i32) {
    %c0_i32 = arith.constant 0 : i32
    %c0_i32_0 = arith.constant 0 : i32
    %c0_i32_1 = arith.constant 0 : i32
    return %c0_i32, %c0_i32_0 : i32, i32
  }
  func.func @transform_5(%arg0: i32, %arg1: i32) -> (i32, i32, i32) {
    %c0_i32 = arith.constant 0 : i32
    %c0_i32_0 = arith.constant 0 : i32
    return %arg0, %arg1, %c0_i32 : i32, i32, i32
  }
}

</mosaic_0001>

<bundles_post_ra>
// kernel: tpu_custom_call.1
= control target key start
LH: loop header
LB: loop body
LE: loop exit
PB: predicated region body
PF: predicated region fallthrough
CT: control target
= control target key end

     0   :  { %s1255_s18 = smov 0   ;;  %s1257_s19 = smov 0   ;;  %s1421_s0 = inlined_call_operand.vmem [shape: f32[2,64,8], index: 0, kind: input, shape index: {}]   ;;  %s1422_s1 = inlined_call_operand.vmem [shape: f32[3,8,16], index: 1, kind: input, shape index: {}]   ;;  %s1423_s2 = inlined_call_operand.vmem [shape: f32[1,16], index: 2, kind: input, shape index: {}]   ;;  %s1424_s3 = inlined_call_operand.vmem [shape: f32[3,16,16], index: 3, kind: input, shape index: {}]   ;;  %s1425_s4 = inlined_call_operand.vmem [shape: f32[1,16], index: 4, kind: input, shape index: {}]   ;;  %s1426_s5 = inlined_call_operand.vmem [shape: f32[2,64,1], index: 5, kind: output, shape index: {}]  }
   0x1   :  { %s1259_s20 = smov 0   ;;  %s1261_s21 = smov 0  }
   0x2   :  { %s1263_s22 = smov 0  }
   0x3 LB: > { %s24_s23 = sadd.s32 1, %s1212_s20  ;;  %s27_s24 = sadd.s32 1, %s1216_s21  ;;  %s1220_s22 = sphi %s1263_s22, %s15_s22   ;;  %s1216_s21 = sphi %s1261_s21, %s1430_s21   ;;  %s1212_s20 = sphi %s1259_s20, %s1429_s20   ;;  %s1208_s19 = sphi %s1257_s19, %s1428_s19   ;;  %s1204_s18 = sphi %s1255_s18, %s1427_s18  }
   0x4   : > { %p25_p0 = scmp.ge.s32.totalorder %s24_s23, 4  ;;  %p1003_p1 = scmp.ge.s32.totalorder %s1220_s22, 1 }
   0x5   : > { %p208_p2 = scmp.lt.s32.totalorder %s1220_s22, 9 }
   0x6   : > { %s1432_s23 = smov (%p25_p0, %s24_s23), 0  ;;  %s1434_s24 = smov (!%p25_p0, %s27_s24), %s1216_s21 }
   0x7   : > { %p209_p3 = pnand %p1003_p1, %p208_p2  ;;  %p29_p4 = scmp.ge.s32.totalorder %s1434_s24, 2 }
   0x8   : > { %s1004_s25 = sshll.u32 (!%p209_p3), %s1204_s18, 1  ;;  %p245_p5 = scmp.lt.s32.totalorder (!%p209_p3), %s1208_s19, 1 }
   0x9   : > { %s1436_s24 = smov (%p29_p4, %s1434_s24), 0  ;;  %212 = sbr.rel (%p209_p3) target bundleno = 618 (0x26a), region = 40 }
   0xa   : > { %p247_p6 = scmp.lt.s32.totalorder (!%p209_p3), %s1004_s25, 7  ;;  %p1010_p7 = scmp.ne.s32.totalorder (!%p209_p3), %s1204_s18, 0 }
   0xe   : > { %s1438_s19 = smov (!%p245_p5, %s1208_s19), 1  ;;  %s1440_s25 = smov (!%p247_p6, %s1004_s25), 7 }
   0xf   : > { %s1005_s26 = sshll.u32 %s1438_s19, 3  ;;  %267 = sbr.rel (%p1010_p7) target bundleno = 22 (0x16), region = 44 }
  0x10   : > { %s250_s27 = sadd.s32 %s1005_s26, %s1440_s25 }
  0x11   : > { %s1006_s28 = sshll.u32 %s250_s27, 3 }
  0x12   : > { %s252_s6 = scalar_lea.vmem %s1421_s0, %s1006_s28  ;;  %s1294_s9 = scalar_lea.vmem %s1426_s5, %s1006_s28 }
  0x14   : > { %vm268_vm0 = vcmask 64512   ;;  %v1222_v0 = vmov 0.0  }
  0x15   : > { %269 = vst.msk [vmem:[#allocation2] sm:$0xff] %vm268_vm0, %v1222_v0 }
  0x16 PF: > { %v1011_v1 = vld [vmem:[%s1422_s1 + $0x8] sm:$0xff]  ;;  %v286_v2 = vld [vmem:[%s1422_s1] sm:$0xff]  ;;  %vm271_vm1 = vcmask 64512   ;;  %v1223_v4 = vmov 0.0   ;;  %vm1224_vm2 = vmmov 0   ;;  %vm292_vm3 = vcmask 1046528  }
  0x17   : > { %1067 = vmatprep.subr.mxu0 %v1223_v4  ;;  %1078 = vmatprep.subr.mxu1 %v1223_v4  ;;  %v273_v5 = vld [vmem:[%s252_s6] sm:$0xff]  ;;  %v277_v6 = vld [vmem:[%s252_s6 + $0x8] sm:$0xff]  ;;  %v1018_v13 = vld [vmem:[%s1422_s1 + $0x10] sm:$0xff]  ;;  %vm472_vm4 = vcmask 1045504   ;;  %s1023_s30 = sshll.u32 %s1204_s18, 4  ;;  %v279_v36 = vlaneseq  ;;  %vm608_vm6 = vcmask 130048  }
  0x18   : > { %1068 = vmatpush3.msra.mxu0 %v1011_v1  ;;  %1069 = vmatprep.mubr.msk.f32.mxu0 %vm1224_vm2, %v1223_v4  ;;  %275 = vst.msk [vmem:[#allocation3 + $0x8] sm:$0xff] %vm271_vm1, %v273_v5  ;;  %276 = vst.msk [vmem:[#allocation3 + $0x10] sm:$0xff] %vm271_vm1, %v277_v6  ;;  %v596_v21 = vld [vmem:[%s1424_s3 + $0x8] sm:$0xff]  ;;  %v595_v22 = vld [vmem:[%s1424_s3] sm:$0xff]  ;;  %s581_s6 = ssub.s32 6, %s1023_s30  ;;  %vm784_vm9 = vcmask 1043456  }
  0x19   : > { %1079 = vmatpush3.msra.mxu1 %v286_v2  ;;  %1080 = vmatprep.mubr.msk.f32.mxu1 %vm1224_vm2, %v1223_v4  ;;  %v1025_v23 = vld [vmem:[%s1424_s3 + $0x18] sm:$0xff]  ;;  %v1024_v24 = vld [vmem:[%s1424_s3 + $0x10] sm:$0xff]  ;;  %v280_v39 = vshrl.u32 %v279_v36, 7  ;;  %v1022_v41 = vld [vmem:[%s1423_s2] ss:$0 sm:$0xff]  ;;  %v582_v43 = vstv %s581_s6  ;;  %vm892_vm10 = vcmask 130050  }
  0x1a   : > { %1089 = vmatprep.subr.mxu0 %v1223_v4  ;;  %1100 = vmatprep.subr.mxu1 %v1223_v4  ;;  %v1033_v1 = vld [vmem:[%s1424_s3 + $0x28] sm:$0xff]  ;;  %v1032_v5 = vld [vmem:[%s1424_s3 + $0x20] sm:$0xff]  ;;  %vm899_vm11 = vcmask 123904   ;;  %vm903_vm12 = vcmask 7170   ;;  %vm905_vm13 = vcmask 7168   ;;  %vm907_vm14 = vcmask 1024  }
  0x1b   : > { %vm583_vm5 = vcmp.ge.s32.totalorder %v280_v39, %v582_v43  ;;  %v281_v48 = vadd.s32 8, %v280_v39  ;;  %v282_v56 = vadd.s32 16, %v280_v39 }
  0x1c   : > { %v270_v3 = vld [vmem:[#allocation2] sm:$0xff] }
  0x1d   : > { %272 = vst.msk [vmem:[#allocation3] sm:$0xff] %vm271_vm1, %v270_v3  ;;  %278 = vst.msk [vmem:[#allocation2] sm:$0xff] %vm271_vm1, %v277_v6  ;;  %vm584_vm7 = vcmp.ge.s32.totalorder %v281_v48, %v582_v43  ;;  %vm585_vm8 = vcmp.ge.s32.totalorder %v282_v56, %v582_v43 }
  0x1f   : > { %v284_v8 = vld [vmem:[#allocation3 + $0x8] sm:$0xff]  ;;  %v285_v10 = vld [vmem:[#allocation3 + $0x10] sm:$0xff] }
  0x20   : > { %v294_v11 = vrot.slane %v284_v8, 1  ;;  %v296_v12 = vrot.slane %v285_v10, 1  ;;  %v474_v17 = vrot.slane %v284_v8, 2  ;;  %v476_v19 = vrot.slane %v285_v10, 2 }
  0x22   : > { %v297_v15 = vsel %vm292_vm3, %v294_v11, %v296_v12  ;;  %v477_v20 = vsel %vm472_vm4, %v474_v17, %v476_v19 }
  0x24   : > { %v283_v7 = vld [vmem:[#allocation3] sm:$0xff] }
  0x25   : > { %v293_v9 = vrot.slane %v283_v7, 1  ;;  %1081 = vmatmul.mubr.msk.f32.vlgmr.msra.gmra.mxu1 %vm271_vm1, %v283_v7  ;;  %v473_v16 = vrot.slane %v283_v7, 2 }
  0x26   : > { %1083 = vmatprep.mubr.msk.f32.mxu1 %vm1224_vm2, %v1223_v4  ;;  %1101 = vmatpush3.msra.mxu1 %v1025_v23 }
  0x27   : > { %v295_v14 = vsel %vm292_vm3, %v293_v9, %v294_v11  ;;  %v475_v18 = vsel %vm472_vm4, %v473_v16, %v474_v17  ;;  %1102 = vmatprep.subr.mxu1 %v1223_v4 }
  0x28   : > { %1070 = vmatmul.mubr.msk.f32.vlgmr.msra.gmra.mxu0 %vm271_vm1, %v295_v14  ;;  %1103 = vmatpush3.msra.mxu1 %v1024_v24 }
  0x29   : > { %1084 = vmatmul.mubr.msk.f32.gmra.mxu1 %vm271_vm1, %v284_v8  ;;  %1090 = vmatpush3.msra.mxu0 %v1018_v13 }
  0x2a   : > { %1072 = vmatprep.mubr.msk.f32.mxu0 %vm1224_vm2, %v1223_v4  ;;  %1086 = vmatprep.mubr.msk.f32.mxu1 %vm1224_vm2, %v1223_v4 }
  0x2b   : > { %1113 = vmatprep.subr.mxu0 %v1223_v4  ;;  %1126 = vmatprep.subr.mxu1 %v1223_v4 }
  0x2c   : > { %1073 = vmatmul.mubr.msk.f32.gmra.mxu0 %vm271_vm1, %v297_v15 }
  0x2d   : > { %1087 = vmatmul.mubr.msk.f32.gmra.mxu1 %vm271_vm1, %v285_v10  ;;  %1075 = vmatprep.mubr.msk.f32.mxu0 %vm1224_vm2, %v1223_v4 }
  0x2e   : > { %1104 = vmatprep.mubr.msk.f32.mxu1 %vm1224_vm2, %v1223_v4 }
  0x30   : > { %1076 = vmatmul.mubr.msk.f32.gmra.mxu0 %vm271_vm1, %v296_v12 }
  0x31   : > { %1091 = vmatprep.mubr.msk.f32.mxu0 %vm1224_vm2, %v1223_v4 }
  0x34   : > { %1092 = vmatmul.mubr.msk.f32.vlgmr.msra.gmra.mxu0 %vm271_vm1, %v475_v18 }
  0x35   : > { %1094 = vmatprep.mubr.msk.f32.mxu0 %vm1224_vm2, %v1223_v4  ;;  %1114 = vmatpush3.msra.mxu0 %v596_v21 }
  0x36   : > { %1115 = vmatprep.subr.mxu0 %v1223_v4 }
  0x37   : > { %1116 = vmatpush3.msra.mxu0 %v595_v22 }
  0x38   : > { %1095 = vmatmul.mubr.msk.f32.gmra.mxu0 %vm271_vm1, %v477_v20 }
  0x39   : > { %1097 = vmatprep.mubr.msk.f32.mxu0 %vm1224_vm2, %v1223_v4 }
  0x3c   : > { %1098 = vmatmul.mubr.msk.f32.gmra.mxu0 %vm271_vm1, %v476_v19 }
  0x3d   : > { %1117 = vmatprep.mubr.msk.f32.mxu0 %vm1224_vm2, %v1223_v4 }
  0xe5   : > { %v456_v25 = vpop.f32.mrf.mxu1 }
  0xe7   : > { %v1082_v26 = vpop.f32.mrf.mxu1 }
  0xe8   : > { %v370_v27 = vpop.f32.mrf.mxu0 }
  0xe9   : > { %v461_v28 = vpop.f32.mrf.mxu1  ;;  %v457_v38 = vadd.f32 %v456_v25, %v370_v27 }
  0xea   : > { %v1071_v29 = vpop.f32.mrf.mxu0 }
  0xeb   : > { %v1085_v30 = vpop.f32.mrf.mxu1 }
  0xec   : > { %v375_v31 = vpop.f32.mrf.mxu0 }
  0xed   : > { %v466_v32 = vpop.f32.mrf.mxu1  ;;  %v462_v45 = vadd.f32 %v461_v28, %v375_v31 }
  0xee   : > { %v1074_v33 = vpop.f32.mrf.mxu0 }
  0xef   : > { %v1088_v34 = vpop.f32.mrf.mxu1 }
  0xf0   : > { %v380_v35 = vpop.f32.mrf.mxu0 }
  0xf1   : > { %v467_v52 = vadd.f32 %v466_v32, %v380_v35 }
  0xf2   : > { %v1077_v37 = vpop.f32.mrf.mxu0 }
  0xf4   : > { %v550_v40 = vpop.f32.mrf.mxu0 }
  0xf5   : > { %v564_v42 = vadd.f32 %v550_v40, %v457_v38 }
  0xf6   : > { %v1093_v44 = vpop.f32.mrf.mxu0 }
  0xf7   : > { %v574_v46 = vadd.f32 %v1022_v41, %v564_v42 }
  0xf8   : > { %v555_v47 = vpop.f32.mrf.mxu0 }
  0xf9   : > { %v577_v49 = vmax.f32 %v574_v46, 0.0  ;;  %v565_v50 = vadd.f32 %v555_v47, %v462_v45 }
  0xfa   : > { %v1096_v51 = vpop.f32.mrf.mxu0 }
  0xfb   : > { %v592_v53 = vsel %vm583_vm5, %v577_v49, 0.0  ;;  %v575_v54 = vadd.f32 %v1022_v41, %v565_v50 }
  0xfc   : > { %v560_v55 = vpop.f32.mrf.mxu0  ;;  %1118 = vmatmul.mubr.msk.f32.vlgmr.msra.gmra.mxu0 %vm608_vm6, %v592_v53  ;;  %v603_v62 = vrot.slane %v592_v53, 2  ;;  %v785_v9 = vrot.slane %v592_v53, 4 }
  0xfd   : > { %v578_v57 = vmax.f32 %v575_v54, 0.0  ;;  %v566_v58 = vadd.f32 %v560_v55, %v467_v52  ;;  %1120 = vmatprep.mubr.msk.f32.mxu0 %vm1224_vm2, %v1223_v4 }
  0xfe   : > { %v1099_v59 = vpop.f32.mrf.mxu0 }
  0xff   : > { %v576_v60 = vadd.f32 %v1022_v41, %v566_v58  ;;  %v593_v61 = vsel %vm584_vm7, %v578_v57, 0.0 }
 0x100   : > { %v604_v63 = vrot.slane %v593_v61, 2  ;;  %1121 = vmatmul.mubr.msk.f32.gmra.mxu0 %vm608_vm6, %v593_v61  ;;  %v786_v8 = vrot.slane %v593_v61, 4 }
 0x101   : > { %v579_v0 = vmax.f32 %v576_v60, 0.0  ;;  %1123 = vmatprep.mubr.msk.f32.mxu0 %vm1224_vm2, %v1223_v4 }
 0x102   : > { %v605_v2 = vsel %vm472_vm4, %v603_v62, %v604_v63  ;;  %v787_v11 = vsel %vm784_vm9, %v785_v9, %v786_v8 }
 0x103   : > { %1105 = vmatmul.mubr.msk.f32.vlgmr.msra.gmra.mxu1 %vm608_vm6, %v605_v2  ;;  %v594_v3 = vsel %vm585_vm8, %v579_v0, 0.0 }
 0x104   : > { %1127 = vmatpush3.msra.mxu1 %v1033_v1  ;;  %v606_v6 = vrot.slane %v594_v3, 2  ;;  %1124 = vmatmul.mubr.msk.f32.gmra.mxu0 %vm608_vm6, %v594_v3  ;;  %v788_v10 = vrot.slane %v594_v3, 4 }
 0x105   : > { %1107 = vmatprep.mubr.msk.f32.mxu1 %vm1224_vm2, %v1223_v4  ;;  %1128 = vmatprep.subr.mxu1 %v1223_v4 }
 0x106   : > { %v607_v7 = vsel %vm472_vm4, %v604_v63, %v606_v6  ;;  %1129 = vmatpush3.msra.mxu1 %v1032_v5  ;;  %v789_v12 = vsel %vm784_vm9, %v786_v8, %v788_v10 }
 0x107   : > { %1108 = vmatmul.mubr.msk.f32.gmra.mxu1 %vm608_vm6, %v607_v7 }
 0x108   : > { %1110 = vmatprep.mubr.msk.f32.mxu1 %vm1224_vm2, %v1223_v4 }
 0x10b   : > { %1111 = vmatmul.mubr.msk.f32.gmra.mxu1 %vm608_vm6, %v606_v6 }
 0x10c   : > { %1130 = vmatprep.mubr.msk.f32.mxu1 %vm1224_vm2, %v1223_v4 }
 0x10f   : > { %1131 = vmatmul.mubr.msk.f32.vlgmr.msra.gmra.mxu1 %vm608_vm6, %v787_v11 }
 0x110   : > { %1133 = vmatprep.mubr.msk.f32.mxu1 %vm1224_vm2, %v1223_v4 }
 0x113   : > { %1134 = vmatmul.mubr.msk.f32.gmra.mxu1 %vm608_vm6, %v789_v12 }
 0x114   : > { %1136 = vmatprep.mubr.msk.f32.mxu1 %vm1224_vm2, %v1223_v4  ;;  %v1037_v4 = vld [vmem:[%s1425_s4] ss:$0 sm:$0xff] }
 0x117   : > { %1137 = vmatmul.mubr.msk.f32.gmra.mxu1 %vm608_vm6, %v788_v10 }
 0x1bc   : > { %v767_v13 = vpop.f32.mrf.mxu0 }
 0x1be   : > { %v1119_v14 = vpop.f32.mrf.mxu0 }
 0x1c0   : > { %v772_v15 = vpop.f32.mrf.mxu0 }
 0x1c2   : > { %v1122_v16 = vpop.f32.mrf.mxu0 }
 0x1c3   : > { %v681_v17 = vpop.f32.mrf.mxu1 }
 0x1c4   : > { %v777_v18 = vpop.f32.mrf.mxu0  ;;  %v768_v25 = vadd.f32 %v767_v13, %v681_v17 }
 0x1c5   : > { %v1106_v19 = vpop.f32.mrf.mxu1 }
 0x1c6   : > { %v1125_v20 = vpop.f32.mrf.mxu0 }
 0x1c7   : > { %v686_v21 = vpop.f32.mrf.mxu1 }
 0x1c8   : > { %v773_v29 = vadd.f32 %v772_v15, %v686_v21 }
 0x1c9   : > { %v1109_v22 = vpop.f32.mrf.mxu1 }
 0x1cb   : > { %v691_v23 = vpop.f32.mrf.mxu1 }
 0x1cc   : > { %v778_v35 = vadd.f32 %v777_v18, %v691_v23 }
 0x1cd   : > { %v1112_v24 = vpop.f32.mrf.mxu1 }
 0x1cf   : > { %v862_v26 = vpop.f32.mrf.mxu1 }
 0x1d0   : > { %v876_v27 = vadd.f32 %v862_v26, %v768_v25 }
 0x1d1   : > { %v1132_v28 = vpop.f32.mrf.mxu1 }
 0x1d2   : > { %v886_v30 = vadd.f32 %v1037_v4, %v876_v27 }
 0x1d3   : > { %v867_v31 = vpop.f32.mrf.mxu1 }
 0x1d4   : > { %v877_v32 = vadd.f32 %v867_v31, %v773_v29  ;;  %v889_v33 = vmax.f32 %v886_v30, 0.0 }
 0x1d5   : > { %v1135_v34 = vpop.f32.mrf.mxu1 }
 0x1d6   : > { %v887_v36 = vadd.f32 %v1037_v4, %v877_v32  ;;  %v893_v37 = vsel %vm892_vm10, %v889_v33, -inf }
 0x1d7   : > { %v872_v38 = vpop.f32.mrf.mxu1  ;;  %894 = vmax.xlane.f32.xlu0 %v893_v37 }
 0x1d8   : > { %v878_v39 = vadd.f32 %v872_v38, %v778_v35  ;;  %v890_v40 = vmax.f32 %v887_v36, 0.0 }
 0x1d9   : > { %v1138_v41 = vpop.f32.mrf.mxu1 }
 0x1da   : > { %v896_v42 = vsel %vm608_vm6, %v890_v40, -inf  ;;  %v888_v43 = vadd.f32 %v1037_v4, %v878_v39 }
 0x1db   : > { %897 = vmax.xlane.f32.xlu0 %v896_v42 }
 0x1dc   : > { %v891_v44 = vmax.f32 %v888_v43, 0.0 }
 0x1de   : > { %v900_v45 = vsel %vm899_vm11, %v891_v44, -inf }
 0x1df   : > { %901 = vmax.xlane.f32.xlu1 %v900_v45 }
 0x260   : > { %v895_v46 = vpop.xlane.xlu0 %894 }
 0x261   : > { %904 = vst.msk [vmem:[%s1294_s9 - $0x2] sm:$0xfc] %vm903_vm12, %v895_v46 }
 0x264   : > { %v898_v47 = vpop.xlane.xlu0 %897 }
 0x265   : > { %906 = vst.msk [vmem:[%s1294_s9 + $0x6] sm:$0xff] %vm905_vm13, %v898_v47 }
 0x268   : > { %v902_v48 = vpop.xlane.xlu1 %901 }
 0x269   : > { %908 = vst.msk [vmem:[%s1294_s9 + $0xe] sm:$0x3] %vm907_vm14, %v902_v48 }
 0x26a PF: > { %s15_s22 = sadd.s32 1, %s1220_s22   ;;  %s1427_s18 = smov %s1212_s20 }
 0x26b   : > { %p12_p8 = scmp.ge.s32.totalorder %s15_s22, 10   ;;  %s1428_s19 = smov %s1216_s21 }
 0x26c   : > { %s1429_s20 = smov %s1432_s23  ;;  %s1430_s21 = smov %s1436_s24 }
 0x26d   :  { %14 = sbr.rel (!%p12_p8) target bundleno = 3 (0x3), region = 78 }

</bundles_post_ra>
